<compile_context>
chip_gen: v7x
topology: tpu7x:2x2x1
jax: 0.10.0
libtpu: 0.0.40
codegen_flags: <defaults>
</compile_context>

<pallas_src>
import functools

import jax
import jax.numpy as jnp
from jax import lax
from jax.experimental import pallas as pl
from jax.experimental.pallas import tpu as pltpu


def _round_up(x, m):
    return (x + m - 1) // m * m


def _region_cls_kernel(x_ref, w1_ref, b1_ref, w2_ref, b2_ref, o_ref, *, eps):
    # x_ref: (row_tile, H) tile of rows.  Weights are full blocks in VMEM with
    # constant index_maps (fetched once, resident across grid steps).
    x = x_ref[...]

    # Linear(H, H): MXU matmul in the input dtype, f32 accumulation.
    h = jnp.dot(x, w1_ref[...], preferred_element_type=jnp.float32)
    h = h + b1_ref[...].astype(jnp.float32)

    # ReLU + BertLayerNorm statistics in f32 (VPU/XLU/EUP work, hidden under
    # the MXU; eps=1e-12 inside rsqrt matches the HF BertLayerNorm).
    h = jnp.maximum(h, 0.0)
    mean = jnp.mean(h, axis=-1, keepdims=True)
    centered = h - mean
    var = jnp.mean(centered * centered, axis=-1, keepdims=True)
    hn = centered * lax.rsqrt(var + eps)     # gamma/beta folded into w2/b2

    # Linear(H, Lp): cast normalized activations to the weight dtype (no-op
    # for f32) so the MXU runs at the bf16 rate when weights are bf16.
    out = jnp.dot(hn.astype(w2_ref.dtype), w2_ref[...],
                  preferred_element_type=jnp.float32)
    out = out + b2_ref[...].astype(jnp.float32)
    o_ref[...] = out.astype(o_ref.dtype)


def _default_row_tile(H, Lp, itemsize):
    """Largest row tile that fits a conservative VMEM budget.

    Budget targets the smallest-VMEM chip (v7x, 64 MiB physical): 2x-buffered
    x/out tiles, 2x-buffered weights (constant index_map, but the second
    buffer is still reserved), and ~3 f32 (row_tile, H) intermediates
    (h, centered, hn).  Gives ~512 rows at H=1024 f32, ~960 at bf16.
    """
    budget = 20 * 1024 * 1024
    weight_bytes = 2 * (H * H + H * Lp) * itemsize           # w1 + w2 buffers
    per_row = 2 * (H + Lp) * itemsize + 3 * H * 4            # x/out bufs + temps
    avail = max(budget - weight_bytes, 0)
    tile = avail // max(per_row, 1)
    tile = max(8, min(1024, int(tile)))
    return tile // 8 * 8


def region_classification(x, params, *, eps=1e-12, row_tile=None):
    """Apply the RegionClassification head.

    x: (..., H) array.  Returns (..., label_dim).
    params: dict with w1 (H,H), b1 (1,H), gamma (1,H), beta (1,H),
            w2 (H,L), b2 (1,L)   -- weights stored [in, out].
    """
    w1, b1, gamma, beta, w2, b2 = (params["w1"], params["b1"], params["gamma"],
                                   params["beta"], params["w2"], params["b2"])
    H = w1.shape[0]
    L = w2.shape[1]

    lead = x.shape[:-1]
    x2 = x.reshape(-1, H)
    N = x2.shape[0]
    itemsize = int(x.dtype.itemsize)

    # Fold the LayerNorm affine into the classifier:
    #   (hn * g + b) @ W2 + b2 == hn @ (g[:, None] * W2) + (b @ W2 + b2)
    w2_eff = (gamma.reshape(H, 1).astype(jnp.float32)
              * w2.astype(jnp.float32)).astype(w2.dtype)
    b2_eff = (beta.reshape(1, H).astype(jnp.float32) @ w2.astype(jnp.float32)
              + b2.astype(jnp.float32)).astype(b2.dtype)

    # Pad the classifier dim to a 128-lane multiple: full MXU output width and
    # unmasked lane-dense output stores.  Sliced off below.
    Lp = _round_up(L, 128)
    if Lp != L:
        w2_eff = jnp.pad(w2_eff, ((0, 0), (0, Lp - L)))
        b2_eff = jnp.pad(b2_eff, ((0, 0), (0, Lp - L)))

    # Fixed row tile so the grid has many steps (DMA/compute overlap + v7x
    # megacore sharding); pad the row count up to a tile multiple.
    if row_tile is None:
        row_tile = _default_row_tile(H, Lp, itemsize)
    row_tile = _round_up(max(8, min(int(row_tile), _round_up(N, 8))), 8)
    Np = _round_up(N, row_tile)
    if Np != N:
        x2 = jnp.pad(x2, ((0, Np - N), (0, 0)))   # padded rows are independent
    grid = (Np // row_tile,)

    kernel = functools.partial(_region_cls_kernel, eps=eps)

    cost = pl.CostEstimate(
        flops=int(2 * Np * H * (H + Lp)),
        transcendentals=int(Np),                                # rsqrt per row
        bytes_accessed=int((Np * H + H * H + H * Lp + 2 * H + Lp + Np * Lp)
                           * itemsize),
    )

    out = pl.pallas_call(
        kernel,
        out_shape=jax.ShapeDtypeStruct((Np, Lp), x.dtype),
        grid_spec=pl.GridSpec(
            grid=grid,
            in_specs=[
                pl.BlockSpec((row_tile, H), lambda i: (i, 0)),  # x tile
                pl.BlockSpec((H, H), lambda i: (0, 0)),         # w1 (resident)
                pl.BlockSpec((1, H), lambda i: (0, 0)),         # b1
                pl.BlockSpec((H, Lp), lambda i: (0, 0)),        # w2 (gamma folded)
                pl.BlockSpec((1, Lp), lambda i: (0, 0)),        # b2 (beta folded)
            ],
            out_specs=pl.BlockSpec((row_tile, Lp), lambda i: (i, 0)),
        ),
        compiler_params=pltpu.CompilerParams(
            dimension_semantics=("parallel",),          # shard rows over TCs
            vmem_limit_bytes=40 * 1024 * 1024,
        ),
        cost_estimate=cost,
    )(x2, w1, b1, w2_eff, b2_eff)

    return out[:N, :L].reshape(*lead, L)


def init_params(key, hidden_size, label_dim, dtype=jnp.float32):
    k1, k2, k3, k4, k5, k6 = jax.random.split(key, 6)
    scale1 = 1.0 / jnp.sqrt(hidden_size)
    return {
        # stored [in, out] so the kernel does x @ W
        "w1": jax.random.uniform(k1, (hidden_size, hidden_size),
                                 minval=-scale1, maxval=scale1).astype(dtype),
        "b1": (0.01 * jax.random.normal(k2, (1, hidden_size))).astype(dtype),
        "gamma": (1.0 + 0.1 * jax.random.normal(k3, (1, hidden_size))).astype(dtype),
        "beta": (0.1 * jax.random.normal(k4, (1, hidden_size))).astype(dtype),
        "w2": jax.random.uniform(k5, (hidden_size, label_dim),
                                 minval=-scale1, maxval=scale1).astype(dtype),
        "b2": (0.01 * jax.random.normal(k6, (1, label_dim))).astype(dtype),
    }


def _reference(x, params, eps=1e-12):
    x = x.astype(jnp.float32)
    h = x @ params["w1"].astype(jnp.float32) + params["b1"].astype(jnp.float32)
    h = jnp.maximum(h, 0.0)
    mean = jnp.mean(h, axis=-1, keepdims=True)
    var = jnp.mean((h - mean) ** 2, axis=-1, keepdims=True)
    hn = (h - mean) / jnp.sqrt(var + eps)
    hn = hn * params["gamma"].astype(jnp.float32) + params["beta"].astype(jnp.float32)
    return hn @ params["w2"].astype(jnp.float32) + params["b2"].astype(jnp.float32)


if __name__ == "__main__":
    key = jax.random.PRNGKey(0)
    k_in, k_par = jax.random.split(key)

    batch, seq, hidden, label_dim = 2, 8, 32, 16
    x = jax.random.normal(k_in, (batch, seq, hidden), dtype=jnp.float32)
    params = init_params(k_par, hidden, label_dim, dtype=jnp.float32)

    # f32 path (exact-ish vs reference; gamma/beta folding checked with
    # non-trivial gamma/beta).
    out = jax.block_until_ready(region_classification(x, params))
    ref = _reference(x.reshape(-1, hidden), params).reshape(batch, seq, label_dim)
    assert out.shape == (batch, seq, label_dim)
    assert jnp.allclose(out, ref, atol=1e-4, rtol=1e-4), "f32 mismatch vs reference"

    # bf16 path: bf16 MXU inputs, f32 accumulation; loose tolerance vs f32 ref.
    x_bf16 = x.astype(jnp.bfloat16)
    params_bf16 = {k: v.astype(jnp.bfloat16) for k, v in params.items()}
    out_bf16 = jax.block_until_ready(region_classification(x_bf16, params_bf16))
    err = jnp.max(jnp.abs(out_bf16.astype(jnp.float32) - ref))
    assert err < 0.15, f"bf16 mismatch vs f32 reference (max |err|={err})"

    # Non-divisible row count exercises row padding and a multi-step grid.
    x_odd = jax.random.normal(k_in, (3, 7, hidden), dtype=jnp.float32)
    out_odd = jax.block_until_ready(
        region_classification(x_odd, params, row_tile=8))
    ref_odd = _reference(x_odd.reshape(-1, hidden), params).reshape(3, 7, label_dim)
    assert jnp.allclose(out_odd, ref_odd, atol=1e-4, rtol=1e-4), "padded-row mismatch"

    print("KERNEL_OK")
</pallas_src>

<mosaic_0001>
module attributes {stable_mosaic.version = 11 : i64} {
  func.func @_region_cls_kernel(%arg0: i32, %arg1: memref<16x32xf32, #tpu.memory_space<vmem>>, %arg2: memref<32x32xf32, #tpu.memory_space<vmem>>, %arg3: memref<1x32xf32, #tpu.memory_space<vmem>>, %arg4: memref<32x128xf32, #tpu.memory_space<vmem>>, %arg5: memref<1x128xf32, #tpu.memory_space<vmem>>, %arg6: memref<16x128xf32, #tpu.memory_space<vmem>>) attributes {dimension_semantics = [#tpu.dimension_semantics<parallel>], iteration_bounds = array<i64: 1>, scalar_prefetch = 0 : i64, scratch_operands = 0 : i64, tpu.core_type = #tpu.core_type<tc>, window_params = [{transform_indices = @transform_0, window_bounds = array<i64: 16, 32>}, {pipeline_mode = #tpu.pipeline_mode<synchronous>, transform_indices = @transform_1, window_bounds = array<i64: 32, 32>}, {pipeline_mode = #tpu.pipeline_mode<synchronous>, transform_indices = @transform_2, window_bounds = array<i64: 1, 32>}, {pipeline_mode = #tpu.pipeline_mode<synchronous>, transform_indices = @transform_3, window_bounds = array<i64: 32, 128>}, {pipeline_mode = #tpu.pipeline_mode<synchronous>, transform_indices = @transform_4, window_bounds = array<i64: 1, 128>}, {transform_indices = @transform_5, window_bounds = array<i64: 16, 128>}]} {
    %c0 = arith.constant 0 : index
    %c0_0 = arith.constant 0 : index
    %0 = vector.load %arg1[%c0, %c0_0] : memref<16x32xf32, #tpu.memory_space<vmem>>, vector<16x32xf32>
    %c0_1 = arith.constant 0 : index
    %c0_2 = arith.constant 0 : index
    %1 = vector.load %arg2[%c0_1, %c0_2] : memref<32x32xf32, #tpu.memory_space<vmem>>, vector<32x32xf32>
    %cst = arith.constant dense<0.000000e+00> : vector<16x32xf32>
    %2 = tpu.matmul %0, %1, %cst {dimension_numbers = #tpu.dot_dimension_numbers<[1], [0], [0], [1], [0, 0, 1, 1], [], []>} : vector<16x32xf32>, vector<32x32xf32>, vector<16x32xf32> -> vector<16x32xf32>
    %c0_3 = arith.constant 0 : index
    %c0_4 = arith.constant 0 : index
    %3 = vector.load %arg3[%c0_3, %c0_4] : memref<1x32xf32, #tpu.memory_space<vmem>>, vector<1x32xf32>
    %4 = vector.broadcast %3 : vector<1x32xf32> to vector<16x32xf32>
    %5 = arith.addf %2, %4 : vector<16x32xf32>
    %cst_5 = arith.constant 0.000000e+00 : f32
    %6 = vector.broadcast %cst_5 : f32 to vector<16x32xf32>
    %7 = arith.maximumf %5, %6 : vector<16x32xf32>
    %cst_6 = arith.constant dense<0.000000e+00> : vector<16xf32>
    %8 = vector.multi_reduction <add>, %7, %cst_6 [1] : vector<16x32xf32> to vector<16xf32>
    %9 = vector.shape_cast %8 : vector<16xf32> to vector<16x1xf32>
    %cst_7 = arith.constant 3.200000e+01 : f32
    %10 = vector.broadcast %cst_7 : f32 to vector<16x1xf32>
    %11 = arith.divf %9, %10 : vector<16x1xf32>
    %12 = vector.broadcast %11 : vector<16x1xf32> to vector<16x32xf32>
    %13 = arith.subf %7, %12 : vector<16x32xf32>
    %14 = arith.mulf %13, %13 : vector<16x32xf32>
    %cst_8 = arith.constant dense<0.000000e+00> : vector<16xf32>
    %15 = vector.multi_reduction <add>, %14, %cst_8 [1] : vector<16x32xf32> to vector<16xf32>
    %16 = vector.shape_cast %15 : vector<16xf32> to vector<16x1xf32>
    %cst_9 = arith.constant 3.200000e+01 : f32
    %17 = vector.broadcast %cst_9 : f32 to vector<16x1xf32>
    %18 = arith.divf %16, %17 : vector<16x1xf32>
    %cst_10 = arith.constant 9.99999996E-13 : f32
    %19 = vector.broadcast %cst_10 : f32 to vector<16x1xf32>
    %20 = arith.addf %18, %19 : vector<16x1xf32>
    %21 = math.rsqrt %20 : vector<16x1xf32>
    %22 = vector.broadcast %21 : vector<16x1xf32> to vector<16x32xf32>
    %23 = arith.mulf %13, %22 : vector<16x32xf32>
    %c0_11 = arith.constant 0 : index
    %c0_12 = arith.constant 0 : index
    %24 = vector.load %arg4[%c0_11, %c0_12] : memref<32x128xf32, #tpu.memory_space<vmem>>, vector<32x128xf32>
    %cst_13 = arith.constant dense<0.000000e+00> : vector<16x128xf32>
    %25 = tpu.matmul %23, %24, %cst_13 {dimension_numbers = #tpu.dot_dimension_numbers<[1], [0], [0], [1], [0, 0, 1, 1], [], []>} : vector<16x32xf32>, vector<32x128xf32>, vector<16x128xf32> -> vector<16x128xf32>
    %c0_14 = arith.constant 0 : index
    %c0_15 = arith.constant 0 : index
    %26 = vector.load %arg5[%c0_14, %c0_15] : memref<1x128xf32, #tpu.memory_space<vmem>>, vector<1x128xf32>
    %27 = vector.broadcast %26 : vector<1x128xf32> to vector<16x128xf32>
    %28 = arith.addf %25, %27 : vector<16x128xf32>
    %c0_16 = arith.constant 0 : index
    %c0_17 = arith.constant 0 : index
    %29 = vector.load %arg6[%c0_16, %c0_17] : memref<16x128xf32, #tpu.memory_space<vmem>>, vector<16x128xf32>
    tpu.vector_store %arg6[%c0_16, %c0_17], %28 {strides = array<i32>} : memref<16x128xf32, #tpu.memory_space<vmem>>, vector<16x128xf32>,
    return
  }
  func.func @transform_0(%arg0: i32) -> (i32, i32) {
    %c0_i32 = arith.constant 0 : i32
    %c0_i32_0 = arith.constant 0 : i32
    return %arg0, %c0_i32 : i32, i32
  }
  func.func @transform_1(%arg0: i32) -> (i32, i32) {
    %c0_i32 = arith.constant 0 : i32
    %c0_i32_0 = arith.constant 0 : i32
    %c0_i32_1 = arith.constant 0 : i32
    return %c0_i32, %c0_i32_0 : i32, i32
  }
  func.func @transform_2(%arg0: i32) -> (i32, i32) {
    %c0_i32 = arith.constant 0 : i32
    %c0_i32_0 = arith.constant 0 : i32
    %c0_i32_1 = arith.constant 0 : i32
    return %c0_i32, %c0_i32_0 : i32, i32
  }
  func.func @transform_3(%arg0: i32) -> (i32, i32) {
    %c0_i32 = arith.constant 0 : i32
    %c0_i32_0 = arith.constant 0 : i32
    %c0_i32_1 = arith.constant 0 : i32
    return %c0_i32, %c0_i32_0 : i32, i32
  }
  func.func @transform_4(%arg0: i32) -> (i32, i32) {
    %c0_i32 = arith.constant 0 : i32
    %c0_i32_0 = arith.constant 0 : i32
    %c0_i32_1 = arith.constant 0 : i32
    return %c0_i32, %c0_i32_0 : i32, i32
  }
  func.func @transform_5(%arg0: i32) -> (i32, i32) {
    %c0_i32 = arith.constant 0 : i32
    %c0_i32_0 = arith.constant 0 : i32
    return %arg0, %c0_i32 : i32, i32
  }
}

</mosaic_0001>

<bundles_post_ra>
// kernel: tpu_custom_call.1
= control target key start
LH: loop header
LB: loop body
LE: loop exit
PB: predicated region body
PF: predicated region fallthrough
CT: control target
= control target key end

     0   :  { %10 = vsyncpa [#allocation3], 0  ;;  %s575_s0 = inlined_call_operand.hbm [shape: f32[16,32], index: 0, kind: input, shape index: {}]   ;;  %s576_s1 = inlined_call_operand.hbm [shape: f32[32,32], index: 1, kind: input, shape index: {}]   ;;  %s577_s2 = inlined_call_operand.vmem [shape: f32[1,32], index: 2, kind: input, shape index: {}]   ;;  %s578_s3 = inlined_call_operand.hbm [shape: f32[32,128], index: 3, kind: input, shape index: {}]   ;;  %s579_s4 = inlined_call_operand.vmem [shape: f32[1,128], index: 4, kind: input, shape index: {}]   ;;  %s580_s5 = inlined_call_operand.hbm [shape: f32[16,128], index: 5, kind: output, shape index: {}]  }
   0x1   :  { %11 = vsyncpa [#allocation6], 0 }
   0x2   :  { %12 = vsyncpa [#allocation4], 0  ;;  %s458_s18 = smov [#allocation5]   ;;  %s459_s20 = smov [#allocation2]  }
   0x3   :  { %s30_s19 = sshll.u32 %s458_s18, 4  ;;  %s18_s21 = sshll.u32 %s459_s20, 4  ;;  %s31_s19 = int_to_ptr.vmem [resolvable:$true] %s30_s19  ;;  %s494_s21 = int_to_ptr.vmem [resolvable:$true] %s18_s21 }
   0x4   :  { %s364_s24 = scalar_lea.hbm %s576_s1, 512 }
   0x5   :  { %p365_p0 = scmp.ne.s32.totalorder %s576_s1, %s364_s24  ;;  %p368_p1 = scmp.lt.u32.totalorder %s364_s24, %s576_s1 }
   0x7   :  { %p370_p2 = pnand %p368_p1, %p365_p0 }
   0x9   :  { %373 = shalt.err (!%p370_p2)
}
   0xa   :  { %s374_s29 = scalar_lea.vmem %s31_s19, 512  ;;  %p379_p4 = scmp.lt.s32.totalorder %s31_s19, %s31_s19 }
   0xb   :  { %p375_p3 = scmp.ne.s32.totalorder %s31_s19, %s374_s29  ;;  %p380_p5 = scmp.lt.s32.totalorder %s374_s29, %s374_s29 }
   0xd   :  { %p381_p6 = por %p380_p5, %p379_p4 }
   0xf   :  { %p382_p7 = pnand %p381_p6, %p375_p3 }
  0x11   :  { %385 = shalt.err (!%p382_p7)
}
  0x12   :  { %s460_s30 = smov 128   ;;  %s461_s6 = smov 8  }
  0x13   :  { %36 = dma.hbm_to_vmem [thread:$0]  %s576_s1, 512, %s31_s19, [#allocation6], %s460_s30, %s460_s30, %s461_s6  }
  0x14   :  { %s386_s11 = scalar_lea.hbm %s575_s0, 256 }
  0x15   :  { %p387_p8 = scmp.ne.s32.totalorder %s575_s0, %s386_s11  ;;  %p390_p9 = scmp.lt.u32.totalorder %s386_s11, %s575_s0 }
  0x17   :  { %p392_p10 = pnand %p390_p9, %p387_p8 }
  0x19   :  { %395 = shalt.err (!%p392_p10)
}
  0x1a   :  { %s396_s16 = scalar_lea.vmem %s494_s21, 256  ;;  %p401_p12 = scmp.lt.s32.totalorder %s494_s21, %s494_s21 }
  0x1b   :  { %p397_p11 = scmp.ne.s32.totalorder %s494_s21, %s396_s16  ;;  %p402_p13 = scmp.lt.s32.totalorder %s396_s16, %s396_s16 }
  0x1d   :  { %p403_p0 = por %p402_p13, %p401_p12 }
  0x1f   :  { %p404_p1 = pnand %p403_p0, %p397_p11 }
  0x21   :  { %407 = shalt.err (!%p404_p1)
}
  0x22   :  { %24 = dma.hbm_to_vmem [thread:$0]  %s575_s0, 256, %s494_s21, [#allocation3], %s460_s30, %s460_s30, %s461_s6  }
  0x23   :  { %s462_s18 = smov [#allocation7]   ;;  %s408_s23 = scalar_lea.hbm %s578_s3, 512 }
  0x24   :  { %s44_s19 = sshll.u32 %s462_s18, 4  ;;  %p409_p2 = scmp.ne.s32.totalorder %s578_s3, %s408_s23  ;;  %s45_s19 = int_to_ptr.vmem [resolvable:$true] %s44_s19 }
  0x25   :  { %p412_p3 = scmp.lt.u32.totalorder %s408_s23, %s578_s3 }
  0x27   :  { %p414_p4 = pnand %p412_p3, %p409_p2 }
  0x29   :  { %417 = shalt.err (!%p414_p4)
}
  0x2a   :  { %s418_s28 = scalar_lea.vmem %s45_s19, 512  ;;  %p423_p6 = scmp.lt.s32.totalorder %s45_s19, %s45_s19 }
  0x2b   :  { %p419_p5 = scmp.ne.s32.totalorder %s45_s19, %s418_s28  ;;  %p424_p7 = scmp.lt.s32.totalorder %s418_s28, %s418_s28 }
  0x2d   :  { %p425_p8 = por %p424_p7, %p423_p6 }
  0x2f   :  { %p426_p9 = pnand %p425_p8, %p419_p5 }
  0x31   :  { %429 = shalt.err (!%p426_p9)
}
  0x32   :  { %50 = dma.hbm_to_vmem [thread:$0]  %s578_s3, 512, %s45_s19, [#allocation6], %s460_s30, %s460_s30, %s461_s6  }
  0x33   :  { %452 = dma.done.wait [#allocation3], 256  }
  0x34   :  { %453 = vsyncadd [#allocation3], 4294967040 }
  0x35   :  { %454 = dma.done.wait [#allocation6], 1024  }
  0x36   :  { %455 = vsyncadd [#allocation6], 4294966272  ;;  %vm75_vm0 = vcmask 261120   ;;  %v64_v0 = vld [vmem:[#allocation5] sm:$0xff]  ;;  %v65_v1 = vld [vmem:[#allocation5 + $0x8] sm:$0xff]  ;;  %s463_s8 = smov [#allocation8]  }
  0x37   :  { %v66_v2 = vld [vmem:[#allocation5 + $0x10] sm:$0xff]  ;;  %v338_v3 = vpack.c.bf16 %v65_v1, %v64_v0  ;;  %v67_v4 = vld [vmem:[#allocation5 + $0x18] sm:$0xff]  ;;  %v186_v27 = vld [vmem:[#allocation7] sm:$0xff]  ;;  %s285_s9 = sshll.u32 %s463_s8, 4  ;;  %s286_s9 = int_to_ptr.vmem [resolvable:$true] %s285_s9 }
  0x38   :  { %v62_v5 = vld [vmem:[#allocation2] sm:$0xff]  ;;  %v342_v6 = vpack.c.bf16 %v67_v4, %v66_v2  ;;  %v63_v7 = vld [vmem:[#allocation2 + $0x8] sm:$0xff]  ;;  %v187_v28 = vld [vmem:[#allocation7 + $0x8] sm:$0xff]  ;;  %s430_s10 = scalar_lea.vmem %s286_s9, 256  ;;  %p435_p11 = scmp.lt.s32.totalorder %s286_s9, %s286_s9 }
  0x39   :  { %324 = vmatprep.mubr.msk.f32.mxu0 %vm75_vm0, %v62_v5  ;;  %339 = vmatprep.subr.bf16.mxu0 %v338_v3  ;;  %v298_v8 = vld [vmem:[%s577_s2] ss:$0 sm:$0xff]  ;;  %v346_v30 = vpack.c.bf16 %v187_v28, %v186_v27  ;;  %v189_v31 = vld [vmem:[#allocation7 + $0x18] sm:$0xff]  ;;  %p431_p10 = scmp.ne.s32.totalorder %s286_s9, %s430_s10  ;;  %p436_p12 = scmp.lt.s32.totalorder %s430_s10, %s430_s10 }
  0x3a   :  { %341 = vmatpush3.bf16.msra.mxu0 %v338_v3  ;;  %v188_v29 = vld [vmem:[#allocation7 + $0x10] sm:$0xff] }
  0x3b   :  { %343 = vmatprep.subr.bf16.mxu0 %v342_v6  ;;  %v350_v32 = vpack.c.bf16 %v189_v31, %v188_v29  ;;  %347 = vmatprep.subr.bf16.mxu1 %v346_v30  ;;  %v301_v43 = vld [vmem:[%s579_s4] ss:$0 sm:$0xff]  ;;  %p437_p13 = por %p436_p12, %p435_p11 }
  0x3c   :  { %349 = vmatpush3.bf16.msra.mxu1 %v346_v30 }
  0x3d   :  { %351 = vmatprep.subr.bf16.mxu1 %v350_v32  ;;  %p438_p0 = pnand %p437_p13, %p431_p10 }
  0x3e   :  { %345 = vmatpush3.bf16.msra.mxu0 %v342_v6 }
  0x40   :  { %353 = vmatpush3.bf16.msra.mxu1 %v350_v32 }
  0x41   :  { %325 = vmatmul.mubr.msk.f32.vlgmr.msra.gmra.mrb[0].mxu0 %vm75_vm0, %v63_v7 }
 0x114   :  { %v326_v9 = vpop.f32.mrb[0].mxu0 }
 0x115   :  { %v148_v10 = vpop.f32.mrb[1].mxu0  ;;  %v154_v11 = vadd.f32 %v326_v9, %v298_v8 }
 0x116   :  { %v149_v12 = vadd.f32 %v298_v8, %v148_v10 }
 0x117   :  { %v158_v14 = vmax.f32 %v154_v11, 0.0 }
 0x118   :  { %v157_v13 = vmax.f32 %v149_v12, 0.0 }
 0x119   :  { %v162_v16 = vsel %vm75_vm0, %v158_v14, 0.0 }
 0x11a   :  { %v159_v15 = vsel %vm75_vm0, %v157_v13, 0.0 }
 0x11b   :  { %160 = vadd.xlane.f32.xlu0 %v159_v15 }
 0x11f   :  { %163 = vadd.xlane.f32.xlu0 %v162_v16 }
 0x1a8   :  { %v161_v17 = vpop.xlane.xlu0 %160 }
 0x1a9   :  { %v166_v18 = vmul.f32 0.03125, %v161_v17 }
 0x1ab   :  { %v168_v19 = vsub.f32 %v157_v13, %v166_v18 }
 0x1ac   :  { %v164_v20 = vpop.xlane.xlu0 %163 }
 0x1ad   :  { %v167_v21 = vmul.f32 0.03125, %v164_v20  ;;  %v170_v22 = vmul.f32 %v168_v19, %v168_v19 }
 0x1af   :  { %v169_v23 = vsub.f32 %v158_v14, %v167_v21  ;;  %v172_v24 = vsel %vm75_vm0, %v170_v22, 0.0 }
 0x1b0   :  { %173 = vadd.xlane.f32.xlu1 %v172_v24 }
 0x1b1   :  { %v171_v25 = vmul.f32 %v169_v23, %v169_v23 }
 0x1b3   :  { %v175_v26 = vsel %vm75_vm0, %v171_v25, 0.0 }
 0x1b4   :  { %176 = vadd.xlane.f32.xlu1 %v175_v26 }
 0x23d   :  { %v174_v33 = vpop.xlane.xlu1 %173 }
 0x23e   :  { %v178_v34 = vmul.f32 0.03125, %v174_v33 }
 0x240   :  { %v180_v35 = vadd.f32 1e-12, %v178_v34 }
 0x241   :  { %v177_v36 = vpop.xlane.xlu1 %176 }
 0x242   :  { %360 = vrsqrt.f32 %v180_v35  ;;  %v179_v37 = vmul.f32 0.03125, %v177_v36 }
 0x244   :  { %v181_v38 = vadd.f32 1e-12, %v179_v37 }
 0x246   :  { %362 = vrsqrt.f32 %v181_v38 }
 0x24c   :  { %v361_v39 = vpop.eup %360 }
 0x24d   :  { %v184_v40 = vmul.f32 %v361_v39, %v168_v19 }
 0x24f   :  { %335 = vmatprep.mubr.msk.f32.mxu1 %vm75_vm0, %v184_v40 }
 0x250   :  { %v363_v41 = vpop.eup %362 }
 0x251   :  { %v185_v42 = vmul.f32 %v363_v41, %v169_v23 }
 0x253   :  { %336 = vmatmul.mubr.msk.f32.vlgmr.msra.gmra.mrb[0].mxu1 %vm75_vm0, %v185_v42 }
 0x326   :  { %v337_v44 = vpop.f32.mrb[0].mxu1 }
 0x327   :  { %v275_v45 = vadd.f32 %v337_v44, %v301_v43  ;;  %v269_v46 = vpop.f32.mrb[1].mxu1 }
 0x328   :  { %v270_v47 = vadd.f32 %v301_v43, %v269_v46 }
 0x329   :  { %279 = vst [vmem:[#allocation8 + $0x8] sm:$0xff] %v275_v45 }
 0x32a   :  { %278 = vst [vmem:[#allocation8] sm:$0xff] %v270_v47 }
 0x32b   :  { %441 = shalt.err (!%p438_p0)
}
 0x32c   :  { %s442_s4 = scalar_lea.hbm %s580_s5, 256 }
 0x32d   :  { %p443_p1 = scmp.ne.s32.totalorder %s580_s5, %s442_s4  ;;  %p446_p2 = scmp.lt.u32.totalorder %s442_s4, %s580_s5 }
 0x32f   :  { %p448_p3 = pnand %p446_p2, %p443_p1 }
 0x331   :  { %451 = shalt.err (!%p448_p3)
}
 0x332   :  { %291 = dma.vmem_to_hbm [thread:$0]  %s286_s9, 256, %s580_s5, [#allocation4], %s460_s30, %s460_s30, %s461_s6  }
 0x333   :  { %456 = dma.done.wait [#allocation4], 256  }
 0x334   :  { %457 = vsyncadd [#allocation4], 4294967040 }
 0x335   :  { %295 = vsyncpa [#allocation3], 1 }
 0x336   :  { %296 = vsyncpa [#allocation6], 1 }
 0x337   :  { %297 = vsyncpa [#allocation4], 1 }

</bundles_post_ra>
